<compile_context>
chip_gen: v5e
topology: v5e:2x2
jax: 0.10.0
libtpu: 0.0.40
codegen_flags: <defaults>
</compile_context>

<pallas_src>
import jax
import jax.numpy as jnp
import numpy as np
from jax.experimental import pallas as pl
from jax.experimental.pallas import tpu as pltpu


LN_EPS = 1e-5  # PyTorch nn.LayerNorm default


def _round_up(x, m):
    return (x + m - 1) // m * m


def condition_encoder_kernel(x_ref, w1_ref, w2_ref, vec_ref, o_ref):
    """One batch tile of LayerNorm(Linear2(ReLU(Linear1(x))))."""
    x = x_ref[...].astype(jnp.bfloat16)                         # [bb, cdim]

    b1 = vec_ref[0:1, :]                                        # (1, d_model) f32
    b2 = vec_ref[1:2, :]
    gamma = vec_ref[2:3, :]
    beta = vec_ref[3:4, :]

    # Linear 1 + ReLU (bf16 MXU matmul, f32 accumulate)
    h = jnp.dot(x, w1_ref[...], preferred_element_type=jnp.float32)
    h = jnp.maximum(h + b1, 0.0)                                # [bb, d_model] f32

    # Linear 2 (bf16 MXU matmul, f32 accumulate)
    y = jnp.dot(h.astype(jnp.bfloat16), w2_ref[...],
                preferred_element_type=jnp.float32) + b2        # [bb, d_model] f32

    # LayerNorm over d_model: single-pass stats (sum and sum of squares) in f32
    inv_n = 1.0 / y.shape[-1]
    mean = jnp.sum(y, axis=-1, keepdims=True) * inv_n
    mean_sq = jnp.sum(y * y, axis=-1, keepdims=True) * inv_n
    var = mean_sq - mean * mean
    out = (y - mean) * jax.lax.rsqrt(var + LN_EPS) * gamma + beta

    o_ref[...] = out.astype(o_ref.dtype)


def prepare_params(params):
    """One-time host-side prep: bf16 weight casts + packed f32 (4, d_model) vector."""
    w1 = params["w1"].astype(jnp.bfloat16)                      # [cdim, d_model]
    w2 = params["w2"].astype(jnp.bfloat16)                      # [d_model, d_model]
    vecs = jnp.stack(
        [params["b1"].reshape(-1), params["b2"].reshape(-1),
         params["gamma"].reshape(-1), params["beta"].reshape(-1)]
    ).astype(jnp.float32)                                       # [4, d_model]
    return {"w1": w1, "w2": w2, "vecs": vecs}


def condition_encoder(condition, prepared_params, *, block_b=1024,
                      out_dtype=None, single_buffer_weights=None):
    """condition: [B, condition_dim] -> [B, d_model]."""
    w1, w2, vecs = (prepared_params["w1"], prepared_params["w2"],
                    prepared_params["vecs"])
    B, cdim = condition.shape
    d_model = w1.shape[1]
    out_dtype = condition.dtype if out_dtype is None else out_dtype
    in_itemsize = np.dtype(condition.dtype).itemsize
    out_itemsize = np.dtype(out_dtype).itemsize

    weight_bytes = int(w1.size) * 2 + int(w2.size) * 2 + int(vecs.size) * 4
    if single_buffer_weights is None:
        # Only worth single-buffering once doubled weights start eating VMEM.
        single_buffer_weights = weight_bytes > (4 << 20)

    try:
        vmem_cap = pltpu.get_tpu_info().vmem_capacity_bytes
    except Exception:
        vmem_cap = 64 * 1024 * 1024                             # conservative (v7x)
    vmem_limit = min(int(vmem_cap * 0.8), 96 * 1024 * 1024)

    # --- batch tile selection -------------------------------------------------
    bb = min(block_b, _round_up(B, 8))
    if B > 256:
        # Ensure >= 2 grid steps so both v7x TensorCores get batch tiles.
        bb = min(bb, _round_up(-(-B // 2), 256))

    def vmem_estimate(tile):
        w_buf = weight_bytes * (1 if single_buffer_weights else 2)
        io_buf = 2 * tile * cdim * in_itemsize + 2 * tile * d_model * out_itemsize
        interm = 3 * tile * d_model * 4                         # h, y, centered (f32)
        return w_buf + io_buf + interm

    while bb > 128 and vmem_estimate(bb) > int(vmem_limit * 0.85):
        bb //= 2

    B_p = _round_up(B, bb)
    while bb > 128 and (B_p - B) * 4 > bb:                      # >25% padding waste
        bb //= 2
        B_p = _round_up(B, bb)

    x = condition if B_p == B else jnp.pad(condition, ((0, B_p - B), (0, 0)))

    if single_buffer_weights:
        def const_spec(shape):
            return pl.BlockSpec(shape, lambda i: (0, 0),
                                pipeline_mode=pl.Buffered(1))
    else:
        def const_spec(shape):
            return pl.BlockSpec(shape, lambda i: (0, 0))

    grid = (B_p // bb,)

    out = pl.pallas_call(
        condition_encoder_kernel,
        out_shape=jax.ShapeDtypeStruct((B_p, d_model), out_dtype),
        grid_spec=pltpu.PrefetchScalarGridSpec(
            num_scalar_prefetch=0,
            grid=grid,
            in_specs=[
                # batch-tiled activation (K = condition_dim, unpadded)
                pl.BlockSpec((bb, cdim), lambda i: (i, 0)),
                # constant parameters, resident across all grid steps
                const_spec((cdim, d_model)),
                const_spec((d_model, d_model)),
                const_spec((4, d_model)),
            ],
            out_specs=pl.BlockSpec((bb, d_model), lambda i: (i, 0)),
        ),
        compiler_params=pltpu.CompilerParams(
            dimension_semantics=("parallel",),
            vmem_limit_bytes=vmem_limit,
        ),
    )(x, w1, w2, vecs)

    return out if B_p == B else out[:B]


def init_params(key, condition_dim, d_model, dtype=jnp.float32):
    """Deterministic parameter init mimicking PyTorch nn.Linear defaults."""
    k1, k2, k3, k4 = jax.random.split(key, 4)

    def linear_init(kw, kb, fan_in, fan_out):
        bound = fan_in ** -0.5
        # stored as [in, out] so the kernel computes x @ W
        w = jax.random.uniform(kw, (fan_in, fan_out), dtype, -bound, bound)
        b = jax.random.uniform(kb, (fan_out,), dtype, -bound, bound)
        return w, b

    w1, b1 = linear_init(k1, k2, condition_dim, d_model)
    w2, b2 = linear_init(k3, k4, d_model, d_model)
    gamma = jnp.ones((d_model,), dtype)
    beta = jnp.zeros((d_model,), dtype)
    return {"w1": w1, "b1": b1, "w2": w2, "b2": b2, "gamma": gamma, "beta": beta}


def condition_encoder_ref(condition, params):
    """Pure-JAX f32 reference of the PyTorch forward."""
    h = jnp.maximum(condition @ params["w1"] + params["b1"], 0.0)
    y = h @ params["w2"] + params["b2"]
    mean = jnp.mean(y, axis=-1, keepdims=True)
    var = jnp.mean((y - mean) ** 2, axis=-1, keepdims=True)
    y_norm = (y - mean) / jnp.sqrt(var + LN_EPS)
    return y_norm * params["gamma"] + params["beta"]


if __name__ == "__main__":
    key = jax.random.PRNGKey(0)
    k_params, k_x = jax.random.split(key)

    batch_size = 10          # deliberately ragged to exercise batch padding
    condition_dim = 16
    d_model = 256

    params = init_params(k_params, condition_dim, d_model)
    prepped = prepare_params(params)   # one-time weight prep (not per forward)
    condition = jax.random.normal(k_x, (batch_size, condition_dim), jnp.float32)

    out = condition_encoder(condition, prepped)
    out = jax.block_until_ready(out)

    ref = condition_encoder_ref(condition, params)
    assert out.shape == (batch_size, d_model)
    # Loose tolerance: kernel uses bf16 weights/activations on the MXU with
    # f32 accumulation, reference is full f32.
    assert jnp.allclose(out, ref, atol=5e-2, rtol=5e-2), "mismatch vs reference"

    print("KERNEL_OK")
</pallas_src>

<mosaic_0001>
module attributes {stable_mosaic.version = 11 : i64} {
  func.func @condition_encoder_kernel(%arg0: i32, %arg1: memref<16x16xf32, #tpu.memory_space<vmem>>, %arg2: memref<16x256xbf16, #tpu.memory_space<vmem>>, %arg3: memref<256x256xbf16, #tpu.memory_space<vmem>>, %arg4: memref<4x256xf32, #tpu.memory_space<vmem>>, %arg5: memref<16x256xf32, #tpu.memory_space<vmem>>) attributes {dimension_semantics = [#tpu.dimension_semantics<parallel>], iteration_bounds = array<i64: 1>, scalar_prefetch = 0 : i64, scratch_operands = 0 : i64, tpu.core_type = #tpu.core_type<tc>, window_params = [{transform_indices = @transform_0, window_bounds = array<i64: 16, 16>}, {pipeline_mode = #tpu.pipeline_mode<synchronous>, transform_indices = @transform_1, window_bounds = array<i64: 16, 256>}, {pipeline_mode = #tpu.pipeline_mode<synchronous>, transform_indices = @transform_2, window_bounds = array<i64: 256, 256>}, {pipeline_mode = #tpu.pipeline_mode<synchronous>, transform_indices = @transform_3, window_bounds = array<i64: 4, 256>}, {transform_indices = @transform_4, window_bounds = array<i64: 16, 256>}]} {
    %c0 = arith.constant 0 : index
    %c0_0 = arith.constant 0 : index
    %0 = vector.load %arg1[%c0, %c0_0] : memref<16x16xf32, #tpu.memory_space<vmem>>, vector<16x16xf32>
    %1 = arith.truncf %0 : vector<16x16xf32> to vector<16x16xbf16>
    %c0_1 = arith.constant 0 : index
    %c0_2 = arith.constant 0 : index
    %2 = vector.load %arg4[%c0_1, %c0_2] : memref<4x256xf32, #tpu.memory_space<vmem>>, vector<1x256xf32>
    %c1 = arith.constant 1 : index
    %c0_3 = arith.constant 0 : index
    %3 = vector.load %arg4[%c1, %c0_3] : memref<4x256xf32, #tpu.memory_space<vmem>>, vector<1x256xf32>
    %c2 = arith.constant 2 : index
    %c0_4 = arith.constant 0 : index
    %4 = vector.load %arg4[%c2, %c0_4] : memref<4x256xf32, #tpu.memory_space<vmem>>, vector<1x256xf32>
    %c3 = arith.constant 3 : index
    %c0_5 = arith.constant 0 : index
    %5 = vector.load %arg4[%c3, %c0_5] : memref<4x256xf32, #tpu.memory_space<vmem>>, vector<1x256xf32>
    %c0_6 = arith.constant 0 : index
    %c0_7 = arith.constant 0 : index
    %6 = vector.load %arg2[%c0_6, %c0_7] : memref<16x256xbf16, #tpu.memory_space<vmem>>, vector<16x256xbf16>
    %cst = arith.constant dense<0.000000e+00> : vector<16x256xf32>
    %7 = tpu.matmul %1, %6, %cst {dimension_numbers = #tpu.dot_dimension_numbers<[1], [0], [0], [1], [0, 0, 1, 1], [], []>} : vector<16x16xbf16>, vector<16x256xbf16>, vector<16x256xf32> -> vector<16x256xf32>
    %8 = vector.broadcast %2 : vector<1x256xf32> to vector<16x256xf32>
    %9 = arith.addf %7, %8 : vector<16x256xf32>
    %cst_8 = arith.constant 0.000000e+00 : f32
    %10 = vector.broadcast %cst_8 : f32 to vector<16x256xf32>
    %11 = arith.maximumf %9, %10 : vector<16x256xf32>
    %12 = arith.truncf %11 : vector<16x256xf32> to vector<16x256xbf16>
    %c0_9 = arith.constant 0 : index
    %c0_10 = arith.constant 0 : index
    %13 = vector.load %arg3[%c0_9, %c0_10] : memref<256x256xbf16, #tpu.memory_space<vmem>>, vector<256x256xbf16>
    %cst_11 = arith.constant dense<0.000000e+00> : vector<16x256xf32>
    %14 = tpu.matmul %12, %13, %cst_11 {dimension_numbers = #tpu.dot_dimension_numbers<[1], [0], [0], [1], [0, 0, 1, 1], [], []>} : vector<16x256xbf16>, vector<256x256xbf16>, vector<16x256xf32> -> vector<16x256xf32>
    %15 = vector.broadcast %3 : vector<1x256xf32> to vector<16x256xf32>
    %16 = arith.addf %14, %15 : vector<16x256xf32>
    %cst_12 = arith.constant dense<0.000000e+00> : vector<16xf32>
    %17 = vector.multi_reduction <add>, %16, %cst_12 [1] : vector<16x256xf32> to vector<16xf32>
    %18 = vector.shape_cast %17 : vector<16xf32> to vector<16x1xf32>
    %cst_13 = arith.constant 3.906250e-03 : f32
    %19 = vector.broadcast %cst_13 : f32 to vector<16x1xf32>
    %20 = arith.mulf %18, %19 : vector<16x1xf32>
    %21 = arith.mulf %16, %16 : vector<16x256xf32>
    %cst_14 = arith.constant dense<0.000000e+00> : vector<16xf32>
    %22 = vector.multi_reduction <add>, %21, %cst_14 [1] : vector<16x256xf32> to vector<16xf32>
    %23 = vector.shape_cast %22 : vector<16xf32> to vector<16x1xf32>
    %cst_15 = arith.constant 3.906250e-03 : f32
    %24 = vector.broadcast %cst_15 : f32 to vector<16x1xf32>
    %25 = arith.mulf %23, %24 : vector<16x1xf32>
    %26 = arith.mulf %20, %20 : vector<16x1xf32>
    %27 = arith.subf %25, %26 : vector<16x1xf32>
    %28 = vector.broadcast %20 : vector<16x1xf32> to vector<16x256xf32>
    %29 = arith.subf %16, %28 : vector<16x256xf32>
    %cst_16 = arith.constant 9.99999974E-6 : f32
    %30 = vector.broadcast %cst_16 : f32 to vector<16x1xf32>
    %31 = arith.addf %27, %30 : vector<16x1xf32>
    %32 = math.rsqrt %31 : vector<16x1xf32>
    %33 = vector.broadcast %32 : vector<16x1xf32> to vector<16x256xf32>
    %34 = arith.mulf %29, %33 : vector<16x256xf32>
    %35 = vector.broadcast %4 : vector<1x256xf32> to vector<16x256xf32>
    %36 = arith.mulf %34, %35 : vector<16x256xf32>
    %37 = vector.broadcast %5 : vector<1x256xf32> to vector<16x256xf32>
    %38 = arith.addf %36, %37 : vector<16x256xf32>
    %c0_17 = arith.constant 0 : index
    %c0_18 = arith.constant 0 : index
    %39 = vector.load %arg5[%c0_17, %c0_18] : memref<16x256xf32, #tpu.memory_space<vmem>>, vector<16x256xf32>
    tpu.vector_store %arg5[%c0_17, %c0_18], %38 {strides = array<i32>} : memref<16x256xf32, #tpu.memory_space<vmem>>, vector<16x256xf32>,
    return
  }
  func.func @transform_0(%arg0: i32) -> (i32, i32) {
    %c0_i32 = arith.constant 0 : i32
    %c0_i32_0 = arith.constant 0 : i32
    return %arg0, %c0_i32 : i32, i32
  }
  func.func @transform_1(%arg0: i32) -> (i32, i32) {
    %c0_i32 = arith.constant 0 : i32
    %c0_i32_0 = arith.constant 0 : i32
    %c0_i32_1 = arith.constant 0 : i32
    return %c0_i32, %c0_i32_0 : i32, i32
  }
  func.func @transform_2(%arg0: i32) -> (i32, i32) {
    %c0_i32 = arith.constant 0 : i32
    %c0_i32_0 = arith.constant 0 : i32
    %c0_i32_1 = arith.constant 0 : i32
    return %c0_i32, %c0_i32_0 : i32, i32
  }
  func.func @transform_3(%arg0: i32) -> (i32, i32) {
    %c0_i32 = arith.constant 0 : i32
    %c0_i32_0 = arith.constant 0 : i32
    %c0_i32_1 = arith.constant 0 : i32
    return %c0_i32, %c0_i32_0 : i32, i32
  }
  func.func @transform_4(%arg0: i32) -> (i32, i32) {
    %c0_i32 = arith.constant 0 : i32
    %c0_i32_0 = arith.constant 0 : i32
    return %arg0, %c0_i32 : i32, i32
  }
}

</mosaic_0001>

<bundles_post_ra>
// kernel: tpu_custom_call.1
= control target key start
LH: loop header
LB: loop body
LE: loop exit
PB: predicated region body
PF: predicated region fallthrough
CT: control target
= control target key end

     0   :  { %9 = vsyncpa [#allocation3], 0  ;;  %s871_s0 = inlined_call_operand.hbm [shape: f32[16,16], index: 0, kind: input, shape index: {}]   ;;  %s872_s1 = inlined_call_operand.hbm [shape: bf16[16,256], index: 1, kind: input, shape index: {}]   ;;  %s873_s2 = inlined_call_operand.hbm [shape: bf16[256,256], index: 2, kind: input, shape index: {}]   ;;  %s874_s3 = inlined_call_operand.hbm [shape: f32[4,256], index: 3, kind: input, shape index: {}]   ;;  %s875_s4 = inlined_call_operand.hbm [shape: f32[16,256], index: 4, kind: output, shape index: {}]  }
   0x1   :  { %10 = vsyncpa [#allocation6], 0 }
   0x2   :  { %11 = vsyncpa [#allocation9], 0 }
   0x3   :  { %12 = vsyncpa [#allocation4], 0  ;;  %s30_s17 = sshll.u32 %s872_s1, 4  ;;  %s808_s18 = smov [#allocation5]   ;;  %s31_s17 = int_to_ptr.hbm [resolvable:$true] %s30_s17 }
   0x4   :  { %s32_s19 = sshll.u32 %s808_s18, 4  ;;  %s17_s22 = sshll.u32 %s871_s0, 4  ;;  %s33_s19 = int_to_ptr.vmem [resolvable:$true] %s32_s19  ;;  %s18_s22 = int_to_ptr.hbm [resolvable:$true] %s17_s22 }
   0x5   :  { %s809_s23 = smov 128   ;;  %s810_s24 = smov 8  }
   0x6   :  { %38 = dma.hbm_to_vmem [thread:$0]  %s31_s17, 256, %s33_s19, [#allocation6], %s809_s23, %s809_s23, %s810_s24  }
   0x7   :  { %s811_s25 = smov [#allocation2]   ;;  %s43_s29 = sshll.u32 %s873_s2, 4  ;;  %s44_s29 = int_to_ptr.hbm [resolvable:$true] %s43_s29 }
   0x8   :  { %s19_s26 = sshll.u32 %s811_s25, 4  ;;  %s57_s5 = sshll.u32 %s874_s3, 4  ;;  %s20_s26 = int_to_ptr.vmem [resolvable:$true] %s19_s26  ;;  %s58_s5 = int_to_ptr.hbm [resolvable:$true] %s57_s5 }
   0x9   :  { %25 = dma.hbm_to_vmem [thread:$0]  %s18_s22, 256, %s20_s26, [#allocation3], %s809_s23, %s809_s23, %s810_s24  }
   0xa   :  { %s812_s6 = smov [#allocation7]   ;;  %s813_s0 = smov [#allocation8]  }
   0xb   :  { %s45_s7 = sshll.u32 %s812_s6, 4  ;;  %s59_s8 = sshll.u32 %s813_s0, 4  ;;  %s46_s7 = int_to_ptr.vmem [resolvable:$true] %s45_s7  ;;  %s60_s8 = int_to_ptr.vmem [resolvable:$true] %s59_s8 }
   0xc   :  { %51 = dma.hbm_to_vmem [thread:$0]  %s44_s29, 4096, %s46_s7, [#allocation6], %s809_s23, %s809_s23, %s810_s24  }
   0xd   :  { %62 = dma.hbm_to_vmem [thread:$0]  %s58_s5, 128, %s60_s8, [#allocation9]  }
   0xe   :  { %800 = dma.done.wait [#allocation3], 256  }
   0xf   :  { %801 = vsyncadd [#allocation3], 4294967040 }
  0x10   :  { %802 = dma.done.wait [#allocation6], 4352  }
  0x11   :  { %803 = vsyncadd [#allocation6], 4294962944 }
  0x12   :  { %804 = dma.done.wait [#allocation9], 128  }
  0x13   :  { %805 = vsyncadd [#allocation9], 4294967168  ;;  %v497_v0 = vld [vmem:[#allocation5] sm:$0xf]  ;;  %v634_v1 = vld [vmem:[#allocation5 + $0x4] sm:$0xf0] }
  0x14   :  { %v633_v2 = vld [vmem:[#allocation5 + $0x4] sm:$0xf]  ;;  %v498_v3 = vor.u32 %v634_v1, %v497_v0  ;;  %v499_v4 = vld [vmem:[#allocation5 + $0x8] sm:$0xf0]  ;;  %v80_v5 = vld [vmem:[#allocation2] sm:$0xff]  ;;  %vm107_vm0 = vcmask 130048  }
  0x15   :  { %v81_v6 = vld [vmem:[#allocation2 + $0x8] sm:$0xff]  ;;  %v502_v7 = vor.u32 %v633_v2, %v499_v4  ;;  %v563_v9 = vld [vmem:[#allocation7 + $0x70] sm:$0xf]  ;;  %v650_v10 = vld [vmem:[#allocation7 + $0x74] sm:$0xf0]  ;;  %s814_s2 = smov [#allocation10]  }
  0x16   :  { %v82_v8 = vpack.c.bf16 %v81_v6, %v80_v5  ;;  %v627_v11 = vld [vmem:[#allocation7 + $0xf0] sm:$0xf]  ;;  %118 = vmatpush.bf16.msra.mxu0 %v498_v3  ;;  %v564_v12 = vor.u32 %v650_v10, %v563_v9  ;;  %v666_v13 = vld [vmem:[#allocation7 + $0xf4] sm:$0xf0]  ;;  %v649_v14 = vld [vmem:[#allocation7 + $0x74] sm:$0xf] }
  0x17   :  { %v565_v15 = vld [vmem:[#allocation7 + $0x78] sm:$0xf0]  ;;  %132 = vmatpush.bf16.msra.mxu1 %v502_v7  ;;  %v628_v16 = vor.u32 %v666_v13, %v627_v11  ;;  %v665_v18 = vld [vmem:[#allocation7 + $0xf4] sm:$0xf]  ;;  %v555_v20 = vld [vmem:[#allocation7 + $0x60] sm:$0xf] }
  0x18   :  { %v568_v17 = vor.u32 %v649_v14, %v565_v15  ;;  %v629_v19 = vld [vmem:[#allocation7 + $0xf8] sm:$0xf0]  ;;  %342 = vmatpush.bf16.msra.mxu2 %v564_v12  ;;  %v648_v22 = vld [vmem:[#allocation7 + $0x64] sm:$0xf0]  ;;  %v619_v23 = vld [vmem:[#allocation7 + $0xe0] sm:$0xf] }
  0x19   :  { %v632_v21 = vor.u32 %v665_v18, %v629_v19  ;;  %v664_v24 = vld [vmem:[#allocation7 + $0xe4] sm:$0xf0]  ;;  %503 = vmatmul.msk.bf16.vlgmr.msra.gmra.mxu0 %vm107_vm0, %v82_v8  ;;  %356 = vmatpush.bf16.msra.mxu3 %v628_v16  ;;  %v556_v25 = vor.u32 %v648_v22, %v555_v20  ;;  %v647_v27 = vld [vmem:[#allocation7 + $0x64] sm:$0xf]  ;;  %v557_v28 = vld [vmem:[#allocation7 + $0x68] sm:$0xf0] }
  0x1a   :  { %v620_v26 = vor.u32 %v664_v24, %v619_v23  ;;  %v663_v29 = vld [vmem:[#allocation7 + $0xe4] sm:$0xf]  ;;  %504 = vmatmul.msk.bf16.vlgmr.msra.gmra.mxu1 %vm107_vm0, %v82_v8  ;;  %370 = vmatpush.bf16.msrb.mxu0 %v568_v17  ;;  %v560_v30 = vor.u32 %v647_v27, %v557_v28  ;;  %v621_v31 = vld [vmem:[#allocation7 + $0xe8] sm:$0xf0]  ;;  %v547_v32 = vld [vmem:[#allocation7 + $0x50] sm:$0xf] }
  0x1b   :  { %v646_v33 = vld [vmem:[#allocation7 + $0x54] sm:$0xf0]  ;;  %384 = vmatpush.bf16.msrb.mxu1 %v632_v21  ;;  %v624_v34 = vor.u32 %v663_v29, %v621_v31  ;;  %v611_v35 = vld [vmem:[#allocation7 + $0xd0] sm:$0xf]  ;;  %v645_v37 = vld [vmem:[#allocation7 + $0x54] sm:$0xf] }
  0x1c   :  { %v662_v36 = vld [vmem:[#allocation7 + $0xd4] sm:$0xf0]  ;;  %343 = vmatpush.bf16.msra.mxu2 %v556_v25  ;;  %v548_v38 = vor.u32 %v646_v33, %v547_v32  ;;  %v549_v39 = vld [vmem:[#allocation7 + $0x58] sm:$0xf0]  ;;  %v661_v40 = vld [vmem:[#allocation7 + $0xd4] sm:$0xf] }
  0x1d   :  { %v613_v41 = vld [vmem:[#allocation7 + $0xd8] sm:$0xf0]  ;;  %357 = vmatpush.bf16.msra.mxu3 %v620_v26  ;;  %v612_v42 = vor.u32 %v662_v36, %v611_v35  ;;  %v539_v43 = vld [vmem:[#allocation7 + $0x40] sm:$0xf]  ;;  %v644_v44 = vld [vmem:[#allocation7 + $0x44] sm:$0xf0]  ;;  %v552_v45 = vor.u32 %v645_v37, %v549_v39 }
  0x1e   :  { %371 = vmatpush.bf16.msrb.mxu0 %v560_v30  ;;  %v603_v46 = vld [vmem:[#allocation7 + $0xc0] sm:$0xf]  ;;  %v660_v47 = vld [vmem:[#allocation7 + $0xc4] sm:$0xf0]  ;;  %v616_v48 = vor.u32 %v661_v40, %v613_v41  ;;  %v643_v49 = vld [vmem:[#allocation7 + $0x44] sm:$0xf]  ;;  %v540_v51 = vor.u32 %v644_v44, %v539_v43 }
  0x1f   :  { %385 = vmatpush.bf16.msrb.mxu1 %v624_v34  ;;  %v541_v50 = vld [vmem:[#allocation7 + $0x48] sm:$0xf0]  ;;  %v659_v52 = vld [vmem:[#allocation7 + $0xc4] sm:$0xf]  ;;  %v604_v54 = vor.u32 %v660_v47, %v603_v46  ;;  %v531_v57 = vld [vmem:[#allocation7 + $0x30] sm:$0xf] }
  0x20   :  { %344 = vmatpush.bf16.msra.mxu2 %v548_v38  ;;  %v605_v53 = vld [vmem:[#allocation7 + $0xc8] sm:$0xf0]  ;;  %v544_v55 = vor.u32 %v643_v49, %v541_v50  ;;  %v642_v58 = vld [vmem:[#allocation7 + $0x34] sm:$0xf0]  ;;  %v595_v59 = vld [vmem:[#allocation7 + $0xb0] sm:$0xf] }
  0x21   :  { %358 = vmatpush.bf16.msra.mxu3 %v612_v42  ;;  %v608_v56 = vor.u32 %v659_v52, %v605_v53  ;;  %v532_v60 = vor.u32 %v642_v58, %v531_v57  ;;  %v658_v61 = vld [vmem:[#allocation7 + $0xb4] sm:$0xf0]  ;;  %v641_v62 = vld [vmem:[#allocation7 + $0x34] sm:$0xf]  ;;  %v533_v63 = vld [vmem:[#allocation7 + $0x38] sm:$0xf0] }
  0x22   :  { %372 = vmatpush.bf16.msrb.mxu0 %v552_v45  ;;  %v596_v0 = vor.u32 %v658_v61, %v595_v59  ;;  %v536_v1 = vor.u32 %v641_v62, %v533_v63  ;;  %v657_v2 = vld [vmem:[#allocation7 + $0xb4] sm:$0xf]  ;;  %v597_v3 = vld [vmem:[#allocation7 + $0xb8] sm:$0xf0]  ;;  %v523_v5 = vld [vmem:[#allocation7 + $0x20] sm:$0xf] }
  0x23   :  { %386 = vmatpush.bf16.msrb.mxu1 %v616_v48  ;;  %v600_v4 = vor.u32 %v657_v2, %v597_v3  ;;  %v640_v6 = vld [vmem:[#allocation7 + $0x24] sm:$0xf0]  ;;  %v587_v8 = vld [vmem:[#allocation7 + $0xa0] sm:$0xf]  ;;  %v639_v10 = vld [vmem:[#allocation7 + $0x24] sm:$0xf] }
  0x24   :  { %345 = vmatpush.bf16.msra.mxu2 %v540_v51  ;;  %v524_v7 = vor.u32 %v640_v6, %v523_v5  ;;  %v656_v9 = vld [vmem:[#allocation7 + $0xa4] sm:$0xf0]  ;;  %v525_v12 = vld [vmem:[#allocation7 + $0x28] sm:$0xf0]  ;;  %v655_v13 = vld [vmem:[#allocation7 + $0xa4] sm:$0xf] }
  0x25   :  { %359 = vmatpush.bf16.msra.mxu3 %v604_v54  ;;  %v588_v11 = vor.u32 %v656_v9, %v587_v8  ;;  %v589_v14 = vld [vmem:[#allocation7 + $0xa8] sm:$0xf0]  ;;  %v528_v15 = vor.u32 %v639_v10, %v525_v12  ;;  %v515_v17 = vld [vmem:[#allocation7 + $0x10] sm:$0xf]  ;;  %v638_v18 = vld [vmem:[#allocation7 + $0x14] sm:$0xf0] }
  0x26   :  { %373 = vmatpush.bf16.msrb.mxu0 %v544_v55  ;;  %v592_v16 = vor.u32 %v655_v13, %v589_v14  ;;  %v579_v19 = vld [vmem:[#allocation7 + $0x90] sm:$0xf]  ;;  %v516_v20 = vor.u32 %v638_v18, %v515_v17  ;;  %v654_v21 = vld [vmem:[#allocation7 + $0x94] sm:$0xf0]  ;;  %v637_v22 = vld [vmem:[#allocation7 + $0x14] sm:$0xf] }
  0x27   :  { %387 = vmatpush.bf16.msrb.mxu1 %v608_v56  ;;  %v517_v23 = vld [vmem:[#allocation7 + $0x18] sm:$0xf0]  ;;  %v580_v24 = vor.u32 %v654_v21, %v579_v19  ;;  %v653_v26 = vld [vmem:[#allocation7 + $0x94] sm:$0xf]  ;;  %v507_v29 = vld [vmem:[#allocation7] sm:$0xf] }
  0x28   :  { %346 = vmatpush.bf16.msra.mxu2 %v532_v60  ;;  %v520_v25 = vor.u32 %v637_v22, %v517_v23  ;;  %v581_v27 = vld [vmem:[#allocation7 + $0x98] sm:$0xf0]  ;;  %v636_v30 = vld [vmem:[#allocation7 + $0x4] sm:$0xf0]  ;;  %v571_v31 = vld [vmem:[#allocation7 + $0x80] sm:$0xf] }
  0x29   :  { %360 = vmatpush.bf16.msra.mxu3 %v596_v0  ;;  %v584_v28 = vor.u32 %v653_v26, %v581_v27  ;;  %v508_v32 = vor.u32 %v636_v30, %v507_v29  ;;  %v652_v33 = vld [vmem:[#allocation7 + $0x84] sm:$0xf0]  ;;  %v635_v34 = vld [vmem:[#allocation7 + $0x4] sm:$0xf]  ;;  %v509_v35 = vld [vmem:[#allocation7 + $0x8] sm:$0xf0] }
  0x2a   :  { %374 = vmatpush.bf16.msrb.mxu0 %v536_v1  ;;  %v572_v36 = vor.u32 %v652_v33, %v571_v31  ;;  %v512_v37 = vor.u32 %v635_v34, %v509_v35  ;;  %v651_v38 = vld [vmem:[#allocation7 + $0x84] sm:$0xf]  ;;  %v573_v39 = vld [vmem:[#allocation7 + $0x88] sm:$0xf0]  ;;  %s478_s3 = sshll.u32 %s814_s2, 4  ;;  %s480_s11 = sshll.u32 %s875_s4, 4  ;;  %s479_s3 = int_to_ptr.vmem [resolvable:$true] %s478_s3  ;;  %s481_s11 = int_to_ptr.hbm [resolvable:$true] %s480_s11 }
  0x2b   :  { %388 = vmatpush.bf16.msrb.mxu1 %v600_v4  ;;  %v576_v40 = vor.u32 %v651_v38, %v573_v39  ;;  %v83_v41 = vld [vmem:[#allocation8] ss:$4 sm:$0x3]  ;;  %v85_v58 = vld [vmem:[#allocation8 + $0x1] ss:$4 sm:$0x3] }
  0x2c   :  { %347 = vmatpush.bf16.msra.mxu2 %v524_v7  ;;  %v93_v44 = vperm.slane %v83_v41, 0  ;;  %v94_v45 = vperm.slane %v83_v41, 1  ;;  %v179_v59 = vperm.slane %v85_v58, 1  ;;  %v178_v62 = vperm.slane %v85_v58, 0  ;;  %s815_s12 = smov 256   ;;  %s816_s13 = smov 16  }
  0x2d   :  { %361 = vmatpush.bf16.msra.mxu3 %v588_v11  ;;  %v87_v39 = vld [vmem:[#allocation8 + $0x2] ss:$4 sm:$0x3] }
  0x2e   :  { %375 = vmatpush.bf16.msrb.mxu0 %v528_v15 }
  0x2f   :  { %389 = vmatpush.bf16.msrb.mxu1 %v592_v16 }
  0x30   :  { %348 = vmatpush.bf16.msra.mxu2 %v516_v20 }
  0x31   :  { %362 = vmatpush.bf16.msra.mxu3 %v580_v24 }
  0x32   :  { %376 = vmatpush.bf16.msrb.mxu0 %v520_v25 }
  0x33   :  { %390 = vmatpush.bf16.msrb.mxu1 %v584_v28 }
  0x34   :  { %349 = vmatpush.bf16.msra.mxu2 %v508_v32 }
  0x35   :  { %363 = vmatpush.bf16.msra.mxu3 %v572_v36 }
  0x36   :  { %377 = vmatpush.bf16.msrb.mxu0 %v512_v37 }
  0x37   :  { %391 = vmatpush.bf16.msrb.mxu1 %v576_v40 }
  0x96   :  { %v120_v42 = vpop.f32.mrf.mxu0 }
  0x97   :  { %v134_v43 = vpop.f32.mrf.mxu1  ;;  %v121_v46 = vadd.f32 %v120_v42, %v93_v44  ;;  %v89_v42 = vld [vmem:[#allocation8 + $0x3] ss:$4 sm:$0x3] }
  0x98   :  { %v135_v47 = vadd.f32 %v134_v43, %v94_v45 }
  0x99   :  { %v139_v52 = vmax.f32 %v121_v46, 0.0 }
  0x9a   :  { %v140_v54 = vmax.f32 %v135_v47, 0.0  ;;  %v453_v47 = vperm.slane %v87_v39, 0 }
  0x9e   :  { %v122_v48 = vpop.f32.mrf.mxu0 }
  0x9f   :  { %v123_v49 = vadd.f32 %v122_v48, %v93_v44  ;;  %v136_v50 = vpop.f32.mrf.mxu1  ;;  %v454_v48 = vperm.slane %v87_v39, 1 }
  0xa0   :  { %v137_v51 = vadd.f32 %v136_v50, %v94_v45 }
  0xa1   :  { %v141_v53 = vmax.f32 %v123_v49, 0.0 }
  0xa2   :  { %v142_v55 = vmax.f32 %v137_v51, 0.0  ;;  %v462_v51 = vperm.slane %v89_v42, 0 }
  0xa3   :  { %v143_v56 = vpack.c.bf16 %v141_v53, %v139_v52  ;;  %v463_v52 = vperm.slane %v89_v42, 1 }
  0xa4   :  { %v144_v57 = vpack.c.bf16 %v142_v55, %v140_v54 }
  0xa5   :  { %350 = vmatmul.bf16.vlgmr.msra.gmra.mxu2 %v143_v56  ;;  %378 = vmatmul.bf16.vlgmr.msrb.gmra.mxu0 %v143_v56 }
  0xa6   :  { %364 = vmatmul.bf16.vlgmr.msra.gmra.mxu3 %v144_v57  ;;  %392 = vmatmul.bf16.vlgmr.msrb.gmra.mxu1 %v144_v57 }
 0x122   :  { %v379_v60 = vpop.f32.mrf.mxu0 }
 0x123   :  { %v380_v61 = vadd.f32 %v379_v60, %v179_v59  ;;  %v393_v63 = vpop.f32.mrf.mxu1 }
 0x125   :  { %v856_v1 = vadd.f32 %v393_v63, %v380_v61 }
 0x127   :  { %v407_v9 = vmul.f32 %v856_v1, %v856_v1 }
 0x128   :  { %v351_v0 = vpop.f32.mrf.mxu2 }
 0x129   :  { %v352_v2 = vadd.f32 %v351_v0, %v178_v62  ;;  %v365_v3 = vpop.f32.mrf.mxu3 }
 0x12a   :  { %v381_v4 = vpop.f32.mrf.mxu0 }
 0x12b   :  { %v366_v5 = vadd.f32 %v365_v3, %v352_v2  ;;  %v382_v6 = vadd.f32 %v381_v4, %v179_v59  ;;  %v395_v11 = vpop.f32.mrf.mxu1 }
 0x12d   :  { %v398_v7 = vadd.f32 %v856_v1, %v366_v5  ;;  %v406_v8 = vmul.f32 %v366_v5, %v366_v5  ;;  %v861_v13 = vadd.f32 %v395_v11, %v382_v6 }
 0x12f   :  { %399 = vadd.xlane.f32.xlu0 %v398_v7  ;;  %v410_v10 = vadd.f32 %v407_v9, %v406_v8  ;;  %v409_v19 = vmul.f32 %v861_v13, %v861_v13 }
 0x130   :  { %v353_v12 = vpop.f32.mrf.mxu2 }
 0x131   :  { %v354_v14 = vadd.f32 %v353_v12, %v178_v62  ;;  %411 = vadd.xlane.f32.xlu1 %v410_v10  ;;  %v367_v15 = vpop.f32.mrf.mxu3 }
 0x133   :  { %v368_v16 = vadd.f32 %v367_v15, %v354_v14 }
 0x135   :  { %v401_v17 = vadd.f32 %v861_v13, %v368_v16  ;;  %v408_v18 = vmul.f32 %v368_v16, %v368_v16 }
 0x137   :  { %402 = vadd.xlane.f32.xlu0 %v401_v17  ;;  %v413_v20 = vadd.f32 %v409_v19, %v408_v18 }
 0x139   :  { %414 = vadd.xlane.f32.xlu1 %v413_v20 }
 0x1a2   :  { %v400_v21 = vpop.xlane.xlu0 %399 }
 0x1a3   :  { %v404_v22 = vmul.f32 0.00390625, %v400_v21 }
 0x1a4   :  { %v412_v23 = vpop.xlane.xlu1 %411 }
 0x1a5   :  { %v416_v24 = vmul.f32 0.00390625, %v412_v23  ;;  %v418_v25 = vmul.f32 %v404_v22, %v404_v22  ;;  %v422_v45 = vsub.f32 %v366_v5, %v404_v22  ;;  %v423_v46 = vsub.f32 %v856_v1, %v404_v22 }
 0x1a7   :  { %v420_v26 = vsub.f32 %v416_v24, %v418_v25 }
 0x1a9   :  { %v426_v27 = vadd.f32 1e-05, %v420_v26 }
 0x1aa   :  { %v403_v28 = vpop.xlane.xlu0 %402 }
 0x1ab   :  { %676 = vrsqrt.f32 %v426_v27  ;;  %v405_v29 = vmul.f32 0.00390625, %v403_v28  ;;  %vm434_vm2 = vweird.f32 %v426_v27 }
 0x1ac   :  { %v415_v30 = vpop.xlane.xlu1 %414 }
 0x1ad   :  { %v417_v31 = vmul.f32 0.00390625, %v415_v30  ;;  %v419_v32 = vmul.f32 %v405_v29, %v405_v29  ;;  %v424_v62 = vsub.f32 %v368_v16, %v405_v29  ;;  %v425_v63 = vsub.f32 %v861_v13, %v405_v29 }
 0x1af   :  { %v421_v33 = vsub.f32 %v417_v31, %v419_v32 }
 0x1b1   :  { %v677_v34 = vpop.eup %676  ;;  %v427_v35 = vadd.f32 1e-05, %v421_v33 }
 0x1b2   :  { %v429_v36 = vmul.f32 %v677_v34, %v426_v27  ;;  %vm435_vm1 = vweird.f32 %v677_v34 }
 0x1b3   :  { %678 = vrsqrt.f32 %v427_v35  ;;  %vm436_vm3 = vmor %vm434_vm2, %vm435_vm1  ;;  %vm444_vm5 = vweird.f32 %v427_v35 }
 0x1b4   :  { %v430_v37 = vmul.f32 %v677_v34, %v429_v36 }
 0x1b6   :  { %v431_v38 = vmul.f32 0.5, %v430_v37 }
 0x1b8   :  { %v432_v40 = vsub.f32 1.5, %v431_v38 }
 0x1b9   :  { %v679_v41 = vpop.eup %678 }
 0x1ba   :  { %v433_v43 = vmul.f32 %v677_v34, %v432_v40  ;;  %v439_v44 = vmul.f32 %v679_v41, %v427_v35  ;;  %vm445_vm4 = vweird.f32 %v679_v41 }
 0x1bb   :  { %vm446_vm6 = vmor %vm444_vm5, %vm445_vm4 }
 0x1bc   :  { %v437_v49 = vsel %vm436_vm3, %v677_v34, %v433_v43  ;;  %v440_v50 = vmul.f32 %v679_v41, %v439_v44 }
 0x1bd   :  { %v448_v53 = vmul.f32 %v437_v49, %v422_v45  ;;  %v449_v54 = vmul.f32 %v437_v49, %v423_v46 }
 0x1be   :  { %v441_v55 = vmul.f32 0.5, %v440_v50 }
 0x1bf   :  { %v457_v56 = vmul.f32 %v453_v47, %v448_v53  ;;  %v458_v57 = vmul.f32 %v454_v48, %v449_v54 }
 0x1c0   :  { %v442_v58 = vsub.f32 1.5, %v441_v55 }
 0x1c1   :  { %v466_v59 = vadd.f32 %v462_v51, %v457_v56  ;;  %v467_v60 = vadd.f32 %v463_v52, %v458_v57 }
 0x1c2   :  { %v443_v61 = vmul.f32 %v679_v41, %v442_v58 }
 0x1c3   :  { %470 = vst [vmem:[#allocation10] sm:$0xff] %v466_v59 }
 0x1c4   :  { %471 = vst [vmem:[#allocation10 + $0x8] sm:$0xff] %v467_v60  ;;  %v447_v0 = vsel %vm446_vm6, %v679_v41, %v443_v61 }
 0x1c5   :  { %v450_v1 = vmul.f32 %v447_v0, %v424_v62  ;;  %v451_v2 = vmul.f32 %v447_v0, %v425_v63 }
 0x1c7   :  { %v459_v3 = vmul.f32 %v453_v47, %v450_v1  ;;  %v460_v4 = vmul.f32 %v454_v48, %v451_v2 }
 0x1c9   :  { %v468_v5 = vadd.f32 %v462_v51, %v459_v3  ;;  %v469_v6 = vadd.f32 %v463_v52, %v460_v4 }
 0x1cb   :  { %472 = vst [vmem:[#allocation10 + $0x10] sm:$0xff] %v468_v5 }
 0x1cc   :  { %473 = vst [vmem:[#allocation10 + $0x18] sm:$0xff] %v469_v6 }
 0x1cd   :  { %486 = dma.vmem_to_hbm [thread:$0]  %s479_s3, 512, %s481_s11, [#allocation4], %s815_s12, %s815_s12, %s816_s13  }
 0x1ce   :  { %806 = dma.done.wait [#allocation4], 512  }
 0x1cf   :  { %807 = vsyncadd [#allocation4], 4294966784 }
 0x1d0   :  { %491 = vsyncpa [#allocation3], 1 }
 0x1d1   :  { %492 = vsyncpa [#allocation6], 1 }
 0x1d2   :  { %493 = vsyncpa [#allocation9], 1 }
 0x1d3   :  { %494 = vsyncpa [#allocation4], 1 }

</bundles_post_ra>
